<compile_context>
chip_gen: v7x
topology: tpu7x:2x2x1
jax: 0.10.0
libtpu: 0.0.40
codegen_flags: <defaults>
</compile_context>

<pallas_src>
import functools

import jax
import jax.numpy as jnp
from jax.experimental import pallas as pl
from jax.experimental.pallas import tpu as pltpu


# ---------------------------------------------------------------------------
# Kernel A: encoder (embedding + mask + mean) + model MLP + decoder layer 1
# ---------------------------------------------------------------------------
def hidden_kernel(tok_ref, msk_ref,                     # scalar prefetch (SMEM)
                  emb_ref,                              # (V, E) f32, resident VMEM
                  w1_ref, b1_ref, w2_ref, b2_ref,       # model MLP (bf16 W, f32 b)
                  wd1_ref, bd1_ref,                     # decoder layer 1
                  d_ref,                                # (B, H) bf16 output
                  pooled_buf,                           # (B, E) f32 scratch
                  *, B, N, V):
    E = emb_ref.shape[1]
    inv_n = 1.0 / N

    # Embedding gather + mask-zeroing + mean over the N gram positions.
    # Table is resident in VMEM, so each row read is a cheap dynamic slice:
    # no tiny per-row DMAs, no semaphores (perf review item).
    for b in range(B):
        acc = jnp.zeros((1, E), jnp.float32)
        for n in range(N):
            idx = b * N + n
            tok = jnp.clip(tok_ref[idx], 0, V - 1)          # clamp OOB token ids
            keep = (msk_ref[idx] == 0).astype(jnp.float32)  # True=masked -> 0
            acc = acc + emb_ref[pl.ds(tok, 1), :] * keep
        pooled_buf[pl.ds(b, 1), :] = acc * inv_n
    pooled = pooled_buf[...]                                 # (B, E) f32

    # self.model: Linear(E,H)+ReLU, Linear(H,E)+ReLU  (bf16 MXU, f32 acc).
    h = jnp.dot(pooled.astype(jnp.bfloat16), w1_ref[...],
                preferred_element_type=jnp.float32) + b1_ref[...]
    h = jnp.maximum(h, 0.0)
    h = jnp.dot(h.astype(jnp.bfloat16), w2_ref[...],
                preferred_element_type=jnp.float32) + b2_ref[...]
    h = jnp.maximum(h, 0.0)

    # Decoder first layer: Linear(E,H)+ReLU.
    d = jnp.dot(h.astype(jnp.bfloat16), wd1_ref[...],
                preferred_element_type=jnp.float32) + bd1_ref[...]
    d = jnp.maximum(d, 0.0)
    d_ref[...] = d.astype(jnp.bfloat16)


# ---------------------------------------------------------------------------
# Kernel B: decoder output layer, vocab-tiled stream of wd2 (parallel axis)
# ---------------------------------------------------------------------------
def logits_kernel(d_ref, wd2_ref, bd2_ref, out_ref):
    out_ref[...] = (jnp.dot(d_ref[...], wd2_ref[...],
                            preferred_element_type=jnp.float32)
                    + bd2_ref[...])


# ---------------------------------------------------------------------------
# Wrapper
# ---------------------------------------------------------------------------
def _pick_tv(V, H, per_buffer_bytes=4 << 20):
    """Largest vocab tile (multiple of 128, divides V) with wd2 tile <= budget."""
    for tv in (1024, 512, 256, 128):
        if V % tv == 0 and H * tv * 2 <= per_buffer_bytes:
            return tv
    return 128


def prepare_params(params):
    """One-time cast of the matmul weights to bf16 (done at load time, NOT per
    forward call — avoids an extra f32 read + bf16 write of wd2 through HBM)."""
    out = dict(params)
    for k in ("w1", "w2", "wd1", "wd2"):
        out[k] = params[k].astype(jnp.bfloat16)
    return out


def lm_forward(tokens, mask, params, *, tv=None):
    """tokens: (B, N) int32, mask: (B, N) bool -> logits (B, V) float32."""
    B, N = tokens.shape
    V, E = params["emb"].shape
    H = params["w1"].shape[1]
    # TODO(synk): pad arbitrary V/E/H to the next multiple of 128 (with zeroed
    # bias/weight lanes) instead of asserting; demo shapes are pre-aligned.
    assert V % 128 == 0 and E % 128 == 0 and H % 128 == 0
    if tv is None:
        tv = _pick_tv(V, H)

    tok_flat = tokens.reshape(-1).astype(jnp.int32)
    msk_flat = mask.reshape(-1).astype(jnp.int32)

    const = lambda i, *_: (0, 0)

    # ---- stage 1: hidden / decoder-input state d (B, H) bf16 --------------
    vmem_a = 2 * (V * E * 4 + 3 * E * H * 2 + (2 * H + E) * 4 + B * H * 2) \
             + B * E * 4 + (2 << 20)
    vmem_a = min(max(vmem_a, 8 << 20), 48 << 20)

    d = pl.pallas_call(
        functools.partial(hidden_kernel, B=B, N=N, V=V),
        out_shape=jax.ShapeDtypeStruct((B, H), jnp.bfloat16),
        grid_spec=pltpu.PrefetchScalarGridSpec(
            num_scalar_prefetch=2,                      # tokens + mask -> SMEM
            grid=(1,),
            in_specs=[
                pl.BlockSpec((V, E), const),            # emb (resident, f32)
                pl.BlockSpec((E, H), const),            # w1
                pl.BlockSpec((1, H), const),            # b1
                pl.BlockSpec((H, E), const),            # w2
                pl.BlockSpec((1, E), const),            # b2
                pl.BlockSpec((E, H), const),            # wd1
                pl.BlockSpec((1, H), const),            # bd1
            ],
            out_specs=pl.BlockSpec((B, H), const),
            scratch_shapes=[pltpu.VMEM((B, E), jnp.float32)],
        ),
        compiler_params=pltpu.CompilerParams(
            dimension_semantics=("arbitrary",),
            vmem_limit_bytes=vmem_a,
        ),
    )(tok_flat, msk_flat,
      params["emb"],
      params["w1"], params["b1"], params["w2"], params["b2"],
      params["wd1"], params["bd1"])

    # ---- stage 2: decoder output layer, vocab axis is "parallel" ----------
    n_vtiles = V // tv
    # Deeper buffering only pays when the vocab stream is long (exposed DMA).
    deep = n_vtiles >= 4
    nbuf = 3 if deep else 2
    wd2_spec_kwargs = dict(pipeline_mode=pl.Buffered(3)) if deep else {}

    vmem_b = (2 * B * H * 2 + nbuf * (H * tv * 2 + tv * 4)
              + 2 * B * tv * 4 + (2 << 20))
    vmem_b = min(max(vmem_b, 8 << 20), 48 << 20)

    logits = pl.pallas_call(
        logits_kernel,
        out_shape=jax.ShapeDtypeStruct((B, V), jnp.float32),
        grid_spec=pltpu.PrefetchScalarGridSpec(
            num_scalar_prefetch=0,
            grid=(n_vtiles,),
            in_specs=[
                pl.BlockSpec((B, H), lambda j: (0, 0)),              # d (resident)
                pl.BlockSpec((H, tv), lambda j: (0, j),
                             **wd2_spec_kwargs),                     # wd2 tile
                pl.BlockSpec((1, tv), lambda j: (0, j),
                             **wd2_spec_kwargs),                     # bd2 tile
            ],
            out_specs=pl.BlockSpec((B, tv), lambda j: (0, j)),
        ),
        compiler_params=pltpu.CompilerParams(
            dimension_semantics=("parallel",),   # both TCs stream wd2 on v7x
            vmem_limit_bytes=vmem_b,
        ),
    )(d, params["wd2"], params["bd2"])

    return logits


# ---------------------------------------------------------------------------
# Pure-JAX reference (same bf16-matmul / f32-accumulate recipe)
# ---------------------------------------------------------------------------
def lm_reference(tokens, mask, params):
    bf = jnp.bfloat16
    emb = params["emb"][tokens]                                    # (B, N, E)
    emb = emb * (1.0 - mask.astype(jnp.float32))[..., None]
    x = emb.sum(1) * (1.0 / tokens.shape[1])                       # (B, E)

    def lin(x, w, b, relu):
        y = jnp.dot(x.astype(bf), w.astype(bf),
                    preferred_element_type=jnp.float32) + b
        return jnp.maximum(y, 0.0) if relu else y

    x = lin(x, params["w1"], params["b1"], True)
    x = lin(x, params["w2"], params["b2"], True)
    x = lin(x, params["wd1"], params["bd1"], True)
    return lin(x, params["wd2"], params["bd2"], False)


def init_params(key, V, E, H):
    ks = jax.random.split(key, 9)
    s = 0.1
    return {
        "emb": jax.random.normal(ks[0], (V, E), jnp.float32) * s,
        # model: Linear(E,H), Linear(H,E)   (weights stored as (in, out))
        "w1": jax.random.normal(ks[1], (E, H), jnp.float32) * s,
        "b1": jax.random.normal(ks[2], (1, H), jnp.float32) * s,
        "w2": jax.random.normal(ks[3], (H, E), jnp.float32) * s,
        "b2": jax.random.normal(ks[4], (1, E), jnp.float32) * s,
        # decoder: Linear(E,H), Linear(H,V)
        "wd1": jax.random.normal(ks[5], (E, H), jnp.float32) * s,
        "bd1": jax.random.normal(ks[6], (1, H), jnp.float32) * s,
        "wd2": jax.random.normal(ks[7], (H, V), jnp.float32) * s,
        "bd2": jax.random.normal(ks[8], (1, V), jnp.float32) * s,
    }


if __name__ == "__main__":
    # Small shapes consistent with the module, 128-lane aligned:
    # B=2 sequences of N=8 grams, vocab V=256, E=128, H=128.
    B, N, V, E, H = 2, 8, 256, 128, 128

    key = jax.random.PRNGKey(0)
    k_tok, k_param = jax.random.split(key)

    tokens = jax.random.randint(k_tok, (B, N), 0, V, dtype=jnp.int32)
    # Mask the last two positions (True = masked), like generate() does.
    mask = jnp.zeros((B, N), dtype=bool).at[:, -2:].set(True)

    params = prepare_params(init_params(k_param, V, E, H))   # weights bf16 once

    out = jax.block_until_ready(lm_forward(tokens, mask, params))
    ref = lm_reference(tokens, mask, params)

    if not jnp.allclose(out, ref, atol=1e-3, rtol=1e-3):
        raise AssertionError("Pallas kernel output mismatch vs reference")
    assert out.shape == (B, V) and out.dtype == jnp.float32
    print("KERNEL_OK")
</pallas_src>

<mosaic_0001>
module attributes {stable_mosaic.version = 11 : i64} {
  func.func @hidden_kernel(%arg0: i32, %arg1: memref<16xi32, #tpu.memory_space<smem>>, %arg2: memref<16xi32, #tpu.memory_space<smem>>, %arg3: memref<256x128xf32, #tpu.memory_space<vmem>>, %arg4: memref<128x128xbf16, #tpu.memory_space<vmem>>, %arg5: memref<1x128xf32, #tpu.memory_space<vmem>>, %arg6: memref<128x128xbf16, #tpu.memory_space<vmem>>, %arg7: memref<1x128xf32, #tpu.memory_space<vmem>>, %arg8: memref<128x128xbf16, #tpu.memory_space<vmem>>, %arg9: memref<1x128xf32, #tpu.memory_space<vmem>>, %arg10: memref<2x128xbf16, #tpu.memory_space<vmem>>, %arg11: memref<2x128xf32, #tpu.memory_space<vmem>>) attributes {dimension_semantics = [#tpu.dimension_semantics<arbitrary>], iteration_bounds = array<i64: 1>, scalar_prefetch = 2 : i64, scratch_operands = 1 : i64, tpu.core_type = #tpu.core_type<tc>, window_params = [{pipeline_mode = #tpu.pipeline_mode<synchronous>, transform_indices = @transform_0, window_bounds = array<i64: 256, 128>}, {pipeline_mode = #tpu.pipeline_mode<synchronous>, transform_indices = @transform_1, window_bounds = array<i64: 128, 128>}, {pipeline_mode = #tpu.pipeline_mode<synchronous>, transform_indices = @transform_2, window_bounds = array<i64: 1, 128>}, {pipeline_mode = #tpu.pipeline_mode<synchronous>, transform_indices = @transform_3, window_bounds = array<i64: 128, 128>}, {pipeline_mode = #tpu.pipeline_mode<synchronous>, transform_indices = @transform_4, window_bounds = array<i64: 1, 128>}, {pipeline_mode = #tpu.pipeline_mode<synchronous>, transform_indices = @transform_5, window_bounds = array<i64: 128, 128>}, {pipeline_mode = #tpu.pipeline_mode<synchronous>, transform_indices = @transform_6, window_bounds = array<i64: 1, 128>}, {pipeline_mode = #tpu.pipeline_mode<synchronous>, transform_indices = @transform_7, window_bounds = array<i64: 2, 128>}]} {
    %cst = arith.constant 0.000000e+00 : f32
    %0 = vector.broadcast %cst : f32 to vector<1x128xf32>
    %c0 = arith.constant 0 : index
    %1 = memref.load %arg1[%c0] : memref<16xi32, #tpu.memory_space<smem>>
    %c0_i32 = arith.constant 0 : i32
    %c255_i32 = arith.constant 255 : i32
    %2 = arith.maxsi %c0_i32, %1 : i32
    %3 = arith.minsi %c255_i32, %2 : i32
    %c0_0 = arith.constant 0 : index
    %4 = memref.load %arg2[%c0_0] : memref<16xi32, #tpu.memory_space<smem>>
    %c0_i32_1 = arith.constant 0 : i32
    %5 = arith.cmpi eq, %4, %c0_i32_1 : i32
    %6 = arith.extui %5 : i1 to i32
    %7 = arith.sitofp %6 : i32 to f32
    %8 = arith.index_cast %3 : i32 to index
    %c0_2 = arith.constant 0 : index
    %9 = vector.load %arg3[%8, %c0_2] : memref<256x128xf32, #tpu.memory_space<vmem>>, vector<1x128xf32>
    %10 = vector.broadcast %7 : f32 to vector<1x128xf32>
    %11 = arith.mulf %9, %10 : vector<1x128xf32>
    %12 = arith.addf %0, %11 : vector<1x128xf32>
    %c1 = arith.constant 1 : index
    %13 = memref.load %arg1[%c1] : memref<16xi32, #tpu.memory_space<smem>>
    %c0_i32_3 = arith.constant 0 : i32
    %c255_i32_4 = arith.constant 255 : i32
    %14 = arith.maxsi %c0_i32_3, %13 : i32
    %15 = arith.minsi %c255_i32_4, %14 : i32
    %c1_5 = arith.constant 1 : index
    %16 = memref.load %arg2[%c1_5] : memref<16xi32, #tpu.memory_space<smem>>
    %c0_i32_6 = arith.constant 0 : i32
    %17 = arith.cmpi eq, %16, %c0_i32_6 : i32
    %18 = arith.extui %17 : i1 to i32
    %19 = arith.sitofp %18 : i32 to f32
    %20 = arith.index_cast %15 : i32 to index
    %c0_7 = arith.constant 0 : index
    %21 = vector.load %arg3[%20, %c0_7] : memref<256x128xf32, #tpu.memory_space<vmem>>, vector<1x128xf32>
    %22 = vector.broadcast %19 : f32 to vector<1x128xf32>
    %23 = arith.mulf %21, %22 : vector<1x128xf32>
    %24 = arith.addf %12, %23 : vector<1x128xf32>
    %c2 = arith.constant 2 : index
    %25 = memref.load %arg1[%c2] : memref<16xi32, #tpu.memory_space<smem>>
    %c0_i32_8 = arith.constant 0 : i32
    %c255_i32_9 = arith.constant 255 : i32
    %26 = arith.maxsi %c0_i32_8, %25 : i32
    %27 = arith.minsi %c255_i32_9, %26 : i32
    %c2_10 = arith.constant 2 : index
    %28 = memref.load %arg2[%c2_10] : memref<16xi32, #tpu.memory_space<smem>>
    %c0_i32_11 = arith.constant 0 : i32
    %29 = arith.cmpi eq, %28, %c0_i32_11 : i32
    %30 = arith.extui %29 : i1 to i32
    %31 = arith.sitofp %30 : i32 to f32
    %32 = arith.index_cast %27 : i32 to index
    %c0_12 = arith.constant 0 : index
    %33 = vector.load %arg3[%32, %c0_12] : memref<256x128xf32, #tpu.memory_space<vmem>>, vector<1x128xf32>
    %34 = vector.broadcast %31 : f32 to vector<1x128xf32>
    %35 = arith.mulf %33, %34 : vector<1x128xf32>
    %36 = arith.addf %24, %35 : vector<1x128xf32>
    %c3 = arith.constant 3 : index
    %37 = memref.load %arg1[%c3] : memref<16xi32, #tpu.memory_space<smem>>
    %c0_i32_13 = arith.constant 0 : i32
    %c255_i32_14 = arith.constant 255 : i32
    %38 = arith.maxsi %c0_i32_13, %37 : i32
    %39 = arith.minsi %c255_i32_14, %38 : i32
    %c3_15 = arith.constant 3 : index
    %40 = memref.load %arg2[%c3_15] : memref<16xi32, #tpu.memory_space<smem>>
    %c0_i32_16 = arith.constant 0 : i32
    %41 = arith.cmpi eq, %40, %c0_i32_16 : i32
    %42 = arith.extui %41 : i1 to i32
    %43 = arith.sitofp %42 : i32 to f32
    %44 = arith.index_cast %39 : i32 to index
    %c0_17 = arith.constant 0 : index
    %45 = vector.load %arg3[%44, %c0_17] : memref<256x128xf32, #tpu.memory_space<vmem>>, vector<1x128xf32>
    %46 = vector.broadcast %43 : f32 to vector<1x128xf32>
    %47 = arith.mulf %45, %46 : vector<1x128xf32>
    %48 = arith.addf %36, %47 : vector<1x128xf32>
    %c4 = arith.constant 4 : index
    %49 = memref.load %arg1[%c4] : memref<16xi32, #tpu.memory_space<smem>>
    %c0_i32_18 = arith.constant 0 : i32
    %c255_i32_19 = arith.constant 255 : i32
    %50 = arith.maxsi %c0_i32_18, %49 : i32
    %51 = arith.minsi %c255_i32_19, %50 : i32
    %c4_20 = arith.constant 4 : index
    %52 = memref.load %arg2[%c4_20] : memref<16xi32, #tpu.memory_space<smem>>
    %c0_i32_21 = arith.constant 0 : i32
    %53 = arith.cmpi eq, %52, %c0_i32_21 : i32
    %54 = arith.extui %53 : i1 to i32
    %55 = arith.sitofp %54 : i32 to f32
    %56 = arith.index_cast %51 : i32 to index
    %c0_22 = arith.constant 0 : index
    %57 = vector.load %arg3[%56, %c0_22] : memref<256x128xf32, #tpu.memory_space<vmem>>, vector<1x128xf32>
    %58 = vector.broadcast %55 : f32 to vector<1x128xf32>
    %59 = arith.mulf %57, %58 : vector<1x128xf32>
    %60 = arith.addf %48, %59 : vector<1x128xf32>
    %c5 = arith.constant 5 : index
    %61 = memref.load %arg1[%c5] : memref<16xi32, #tpu.memory_space<smem>>
    %c0_i32_23 = arith.constant 0 : i32
    %c255_i32_24 = arith.constant 255 : i32
    %62 = arith.maxsi %c0_i32_23, %61 : i32
    %63 = arith.minsi %c255_i32_24, %62 : i32
    %c5_25 = arith.constant 5 : index
    %64 = memref.load %arg2[%c5_25] : memref<16xi32, #tpu.memory_space<smem>>
    %c0_i32_26 = arith.constant 0 : i32
    %65 = arith.cmpi eq, %64, %c0_i32_26 : i32
    %66 = arith.extui %65 : i1 to i32
    %67 = arith.sitofp %66 : i32 to f32
    %68 = arith.index_cast %63 : i32 to index
    %c0_27 = arith.constant 0 : index
    %69 = vector.load %arg3[%68, %c0_27] : memref<256x128xf32, #tpu.memory_space<vmem>>, vector<1x128xf32>
    %70 = vector.broadcast %67 : f32 to vector<1x128xf32>
    %71 = arith.mulf %69, %70 : vector<1x128xf32>
    %72 = arith.addf %60, %71 : vector<1x128xf32>
    %c6 = arith.constant 6 : index
    %73 = memref.load %arg1[%c6] : memref<16xi32, #tpu.memory_space<smem>>
    %c0_i32_28 = arith.constant 0 : i32
    %c255_i32_29 = arith.constant 255 : i32
    %74 = arith.maxsi %c0_i32_28, %73 : i32
    %75 = arith.minsi %c255_i32_29, %74 : i32
    %c6_30 = arith.constant 6 : index
    %76 = memref.load %arg2[%c6_30] : memref<16xi32, #tpu.memory_space<smem>>
    %c0_i32_31 = arith.constant 0 : i32
    %77 = arith.cmpi eq, %76, %c0_i32_31 : i32
    %78 = arith.extui %77 : i1 to i32
    %79 = arith.sitofp %78 : i32 to f32
    %80 = arith.index_cast %75 : i32 to index
    %c0_32 = arith.constant 0 : index
    %81 = vector.load %arg3[%80, %c0_32] : memref<256x128xf32, #tpu.memory_space<vmem>>, vector<1x128xf32>
    %82 = vector.broadcast %79 : f32 to vector<1x128xf32>
    %83 = arith.mulf %81, %82 : vector<1x128xf32>
    %84 = arith.addf %72, %83 : vector<1x128xf32>
    %c7 = arith.constant 7 : index
    %85 = memref.load %arg1[%c7] : memref<16xi32, #tpu.memory_space<smem>>
    %c0_i32_33 = arith.constant 0 : i32
    %c255_i32_34 = arith.constant 255 : i32
    %86 = arith.maxsi %c0_i32_33, %85 : i32
    %87 = arith.minsi %c255_i32_34, %86 : i32
    %c7_35 = arith.constant 7 : index
    %88 = memref.load %arg2[%c7_35] : memref<16xi32, #tpu.memory_space<smem>>
    %c0_i32_36 = arith.constant 0 : i32
    %89 = arith.cmpi eq, %88, %c0_i32_36 : i32
    %90 = arith.extui %89 : i1 to i32
    %91 = arith.sitofp %90 : i32 to f32
    %92 = arith.index_cast %87 : i32 to index
    %c0_37 = arith.constant 0 : index
    %93 = vector.load %arg3[%92, %c0_37] : memref<256x128xf32, #tpu.memory_space<vmem>>, vector<1x128xf32>
    %94 = vector.broadcast %91 : f32 to vector<1x128xf32>
    %95 = arith.mulf %93, %94 : vector<1x128xf32>
    %96 = arith.addf %84, %95 : vector<1x128xf32>
    %cst_38 = arith.constant 1.250000e-01 : f32
    %97 = vector.broadcast %cst_38 : f32 to vector<1x128xf32>
    %98 = arith.mulf %96, %97 : vector<1x128xf32>
    %c0_39 = arith.constant 0 : index
    %c0_40 = arith.constant 0 : index
    %99 = vector.load %arg11[%c0_39, %c0_40] : memref<2x128xf32, #tpu.memory_space<vmem>>, vector<1x128xf32>
    tpu.vector_store %arg11[%c0_39, %c0_40], %98 {strides = array<i32>} : memref<2x128xf32, #tpu.memory_space<vmem>>, vector<1x128xf32>,
    %cst_41 = arith.constant 0.000000e+00 : f32
    %100 = vector.broadcast %cst_41 : f32 to vector<1x128xf32>
    %c8 = arith.constant 8 : index
    %101 = memref.load %arg1[%c8] : memref<16xi32, #tpu.memory_space<smem>>
    %c0_i32_42 = arith.constant 0 : i32
    %c255_i32_43 = arith.constant 255 : i32
    %102 = arith.maxsi %c0_i32_42, %101 : i32
    %103 = arith.minsi %c255_i32_43, %102 : i32
    %c8_44 = arith.constant 8 : index
    %104 = memref.load %arg2[%c8_44] : memref<16xi32, #tpu.memory_space<smem>>
    %c0_i32_45 = arith.constant 0 : i32
    %105 = arith.cmpi eq, %104, %c0_i32_45 : i32
    %106 = arith.extui %105 : i1 to i32
    %107 = arith.sitofp %106 : i32 to f32
    %108 = arith.index_cast %103 : i32 to index
    %c0_46 = arith.constant 0 : index
    %109 = vector.load %arg3[%108, %c0_46] : memref<256x128xf32, #tpu.memory_space<vmem>>, vector<1x128xf32>
    %110 = vector.broadcast %107 : f32 to vector<1x128xf32>
    %111 = arith.mulf %109, %110 : vector<1x128xf32>
    %112 = arith.addf %100, %111 : vector<1x128xf32>
    %c9 = arith.constant 9 : index
    %113 = memref.load %arg1[%c9] : memref<16xi32, #tpu.memory_space<smem>>
    %c0_i32_47 = arith.constant 0 : i32
    %c255_i32_48 = arith.constant 255 : i32
    %114 = arith.maxsi %c0_i32_47, %113 : i32
    %115 = arith.minsi %c255_i32_48, %114 : i32
    %c9_49 = arith.constant 9 : index
    %116 = memref.load %arg2[%c9_49] : memref<16xi32, #tpu.memory_space<smem>>
    %c0_i32_50 = arith.constant 0 : i32
    %117 = arith.cmpi eq, %116, %c0_i32_50 : i32
    %118 = arith.extui %117 : i1 to i32
    %119 = arith.sitofp %118 : i32 to f32
    %120 = arith.index_cast %115 : i32 to index
    %c0_51 = arith.constant 0 : index
    %121 = vector.load %arg3[%120, %c0_51] : memref<256x128xf32, #tpu.memory_space<vmem>>, vector<1x128xf32>
    %122 = vector.broadcast %119 : f32 to vector<1x128xf32>
    %123 = arith.mulf %121, %122 : vector<1x128xf32>
    %124 = arith.addf %112, %123 : vector<1x128xf32>
    %c10 = arith.constant 10 : index
    %125 = memref.load %arg1[%c10] : memref<16xi32, #tpu.memory_space<smem>>
    %c0_i32_52 = arith.constant 0 : i32
    %c255_i32_53 = arith.constant 255 : i32
    %126 = arith.maxsi %c0_i32_52, %125 : i32
    %127 = arith.minsi %c255_i32_53, %126 : i32
    %c10_54 = arith.constant 10 : index
    %128 = memref.load %arg2[%c10_54] : memref<16xi32, #tpu.memory_space<smem>>
    %c0_i32_55 = arith.constant 0 : i32
    %129 = arith.cmpi eq, %128, %c0_i32_55 : i32
    %130 = arith.extui %129 : i1 to i32
    %131 = arith.sitofp %130 : i32 to f32
    %132 = arith.index_cast %127 : i32 to index
    %c0_56 = arith.constant 0 : index
    %133 = vector.load %arg3[%132, %c0_56] : memref<256x128xf32, #tpu.memory_space<vmem>>, vector<1x128xf32>
    %134 = vector.broadcast %131 : f32 to vector<1x128xf32>
    %135 = arith.mulf %133, %134 : vector<1x128xf32>
    %136 = arith.addf %124, %135 : vector<1x128xf32>
    %c11 = arith.constant 11 : index
    %137 = memref.load %arg1[%c11] : memref<16xi32, #tpu.memory_space<smem>>
    %c0_i32_57 = arith.constant 0 : i32
    %c255_i32_58 = arith.constant 255 : i32
    %138 = arith.maxsi %c0_i32_57, %137 : i32
    %139 = arith.minsi %c255_i32_58, %138 : i32
    %c11_59 = arith.constant 11 : index
    %140 = memref.load %arg2[%c11_59] : memref<16xi32, #tpu.memory_space<smem>>
    %c0_i32_60 = arith.constant 0 : i32
    %141 = arith.cmpi eq, %140, %c0_i32_60 : i32
    %142 = arith.extui %141 : i1 to i32
    %143 = arith.sitofp %142 : i32 to f32
    %144 = arith.index_cast %139 : i32 to index
    %c0_61 = arith.constant 0 : index
    %145 = vector.load %arg3[%144, %c0_61] : memref<256x128xf32, #tpu.memory_space<vmem>>, vector<1x128xf32>
    %146 = vector.broadcast %143 : f32 to vector<1x128xf32>
    %147 = arith.mulf %145, %146 : vector<1x128xf32>
    %148 = arith.addf %136, %147 : vector<1x128xf32>
    %c12 = arith.constant 12 : index
    %149 = memref.load %arg1[%c12] : memref<16xi32, #tpu.memory_space<smem>>
    %c0_i32_62 = arith.constant 0 : i32
    %c255_i32_63 = arith.constant 255 : i32
    %150 = arith.maxsi %c0_i32_62, %149 : i32
    %151 = arith.minsi %c255_i32_63, %150 : i32
    %c12_64 = arith.constant 12 : index
    %152 = memref.load %arg2[%c12_64] : memref<16xi32, #tpu.memory_space<smem>>
    %c0_i32_65 = arith.constant 0 : i32
    %153 = arith.cmpi eq, %152, %c0_i32_65 : i32
    %154 = arith.extui %153 : i1 to i32
    %155 = arith.sitofp %154 : i32 to f32
    %156 = arith.index_cast %151 : i32 to index
    %c0_66 = arith.constant 0 : index
    %157 = vector.load %arg3[%156, %c0_66] : memref<256x128xf32, #tpu.memory_space<vmem>>, vector<1x128xf32>
    %158 = vector.broadcast %155 : f32 to vector<1x128xf32>
    %159 = arith.mulf %157, %158 : vector<1x128xf32>
    %160 = arith.addf %148, %159 : vector<1x128xf32>
    %c13 = arith.constant 13 : index
    %161 = memref.load %arg1[%c13] : memref<16xi32, #tpu.memory_space<smem>>
    %c0_i32_67 = arith.constant 0 : i32
    %c255_i32_68 = arith.constant 255 : i32
    %162 = arith.maxsi %c0_i32_67, %161 : i32
    %163 = arith.minsi %c255_i32_68, %162 : i32
    %c13_69 = arith.constant 13 : index
    %164 = memref.load %arg2[%c13_69] : memref<16xi32, #tpu.memory_space<smem>>
    %c0_i32_70 = arith.constant 0 : i32
    %165 = arith.cmpi eq, %164, %c0_i32_70 : i32
    %166 = arith.extui %165 : i1 to i32
    %167 = arith.sitofp %166 : i32 to f32
    %168 = arith.index_cast %163 : i32 to index
    %c0_71 = arith.constant 0 : index
    %169 = vector.load %arg3[%168, %c0_71] : memref<256x128xf32, #tpu.memory_space<vmem>>, vector<1x128xf32>
    %170 = vector.broadcast %167 : f32 to vector<1x128xf32>
    %171 = arith.mulf %169, %170 : vector<1x128xf32>
    %172 = arith.addf %160, %171 : vector<1x128xf32>
    %c14 = arith.constant 14 : index
    %173 = memref.load %arg1[%c14] : memref<16xi32, #tpu.memory_space<smem>>
    %c0_i32_72 = arith.constant 0 : i32
    %c255_i32_73 = arith.constant 255 : i32
    %174 = arith.maxsi %c0_i32_72, %173 : i32
    %175 = arith.minsi %c255_i32_73, %174 : i32
    %c14_74 = arith.constant 14 : index
    %176 = memref.load %arg2[%c14_74] : memref<16xi32, #tpu.memory_space<smem>>
    %c0_i32_75 = arith.constant 0 : i32
    %177 = arith.cmpi eq, %176, %c0_i32_75 : i32
    %178 = arith.extui %177 : i1 to i32
    %179 = arith.sitofp %178 : i32 to f32
    %180 = arith.index_cast %175 : i32 to index
    %c0_76 = arith.constant 0 : index
    %181 = vector.load %arg3[%180, %c0_76] : memref<256x128xf32, #tpu.memory_space<vmem>>, vector<1x128xf32>
    %182 = vector.broadcast %179 : f32 to vector<1x128xf32>
    %183 = arith.mulf %181, %182 : vector<1x128xf32>
    %184 = arith.addf %172, %183 : vector<1x128xf32>
    %c15 = arith.constant 15 : index
    %185 = memref.load %arg1[%c15] : memref<16xi32, #tpu.memory_space<smem>>
    %c0_i32_77 = arith.constant 0 : i32
    %c255_i32_78 = arith.constant 255 : i32
    %186 = arith.maxsi %c0_i32_77, %185 : i32
    %187 = arith.minsi %c255_i32_78, %186 : i32
    %c15_79 = arith.constant 15 : index
    %188 = memref.load %arg2[%c15_79] : memref<16xi32, #tpu.memory_space<smem>>
    %c0_i32_80 = arith.constant 0 : i32
    %189 = arith.cmpi eq, %188, %c0_i32_80 : i32
    %190 = arith.extui %189 : i1 to i32
    %191 = arith.sitofp %190 : i32 to f32
    %192 = arith.index_cast %187 : i32 to index
    %c0_81 = arith.constant 0 : index
    %193 = vector.load %arg3[%192, %c0_81] : memref<256x128xf32, #tpu.memory_space<vmem>>, vector<1x128xf32>
    %194 = vector.broadcast %191 : f32 to vector<1x128xf32>
    %195 = arith.mulf %193, %194 : vector<1x128xf32>
    %196 = arith.addf %184, %195 : vector<1x128xf32>
    %cst_82 = arith.constant 1.250000e-01 : f32
    %197 = vector.broadcast %cst_82 : f32 to vector<1x128xf32>
    %198 = arith.mulf %196, %197 : vector<1x128xf32>
    %c1_83 = arith.constant 1 : index
    %c0_84 = arith.constant 0 : index
    %199 = vector.load %arg11[%c1_83, %c0_84] : memref<2x128xf32, #tpu.memory_space<vmem>>, vector<1x128xf32>
    tpu.vector_store %arg11[%c1_83, %c0_84], %198 {strides = array<i32>} : memref<2x128xf32, #tpu.memory_space<vmem>>, vector<1x128xf32>,
    %c0_85 = arith.constant 0 : index
    %c0_86 = arith.constant 0 : index
    %200 = vector.load %arg11[%c0_85, %c0_86] : memref<2x128xf32, #tpu.memory_space<vmem>>, vector<2x128xf32>
    %201 = arith.truncf %200 : vector<2x128xf32> to vector<2x128xbf16>
    %c0_87 = arith.constant 0 : index
    %c0_88 = arith.constant 0 : index
    %202 = vector.load %arg4[%c0_87, %c0_88] : memref<128x128xbf16, #tpu.memory_space<vmem>>, vector<128x128xbf16>
    %cst_89 = arith.constant dense<0.000000e+00> : vector<2x128xf32>
    %203 = tpu.matmul %201, %202, %cst_89 {dimension_numbers = #tpu.dot_dimension_numbers<[1], [0], [0], [1], [0, 0, 1, 1], [], []>} : vector<2x128xbf16>, vector<128x128xbf16>, vector<2x128xf32> -> vector<2x128xf32>
    %c0_90 = arith.constant 0 : index
    %c0_91 = arith.constant 0 : index
    %204 = vector.load %arg5[%c0_90, %c0_91] : memref<1x128xf32, #tpu.memory_space<vmem>>, vector<1x128xf32>
    %205 = vector.broadcast %204 : vector<1x128xf32> to vector<2x128xf32>
    %206 = arith.addf %203, %205 : vector<2x128xf32>
    %cst_92 = arith.constant 0.000000e+00 : f32
    %207 = vector.broadcast %cst_92 : f32 to vector<2x128xf32>
    %208 = arith.maximumf %206, %207 : vector<2x128xf32>
    %209 = arith.truncf %208 : vector<2x128xf32> to vector<2x128xbf16>
    %c0_93 = arith.constant 0 : index
    %c0_94 = arith.constant 0 : index
    %210 = vector.load %arg6[%c0_93, %c0_94] : memref<128x128xbf16, #tpu.memory_space<vmem>>, vector<128x128xbf16>
    %cst_95 = arith.constant dense<0.000000e+00> : vector<2x128xf32>
    %211 = tpu.matmul %209, %210, %cst_95 {dimension_numbers = #tpu.dot_dimension_numbers<[1], [0], [0], [1], [0, 0, 1, 1], [], []>} : vector<2x128xbf16>, vector<128x128xbf16>, vector<2x128xf32> -> vector<2x128xf32>
    %c0_96 = arith.constant 0 : index
    %c0_97 = arith.constant 0 : index
    %212 = vector.load %arg7[%c0_96, %c0_97] : memref<1x128xf32, #tpu.memory_space<vmem>>, vector<1x128xf32>
    %213 = vector.broadcast %212 : vector<1x128xf32> to vector<2x128xf32>
    %214 = arith.addf %211, %213 : vector<2x128xf32>
    %cst_98 = arith.constant 0.000000e+00 : f32
    %215 = vector.broadcast %cst_98 : f32 to vector<2x128xf32>
    %216 = arith.maximumf %214, %215 : vector<2x128xf32>
    %217 = arith.truncf %216 : vector<2x128xf32> to vector<2x128xbf16>
    %c0_99 = arith.constant 0 : index
    %c0_100 = arith.constant 0 : index
    %218 = vector.load %arg8[%c0_99, %c0_100] : memref<128x128xbf16, #tpu.memory_space<vmem>>, vector<128x128xbf16>
    %cst_101 = arith.constant dense<0.000000e+00> : vector<2x128xf32>
    %219 = tpu.matmul %217, %218, %cst_101 {dimension_numbers = #tpu.dot_dimension_numbers<[1], [0], [0], [1], [0, 0, 1, 1], [], []>} : vector<2x128xbf16>, vector<128x128xbf16>, vector<2x128xf32> -> vector<2x128xf32>
    %c0_102 = arith.constant 0 : index
    %c0_103 = arith.constant 0 : index
    %220 = vector.load %arg9[%c0_102, %c0_103] : memref<1x128xf32, #tpu.memory_space<vmem>>, vector<1x128xf32>
    %221 = vector.broadcast %220 : vector<1x128xf32> to vector<2x128xf32>
    %222 = arith.addf %219, %221 : vector<2x128xf32>
    %cst_104 = arith.constant 0.000000e+00 : f32
    %223 = vector.broadcast %cst_104 : f32 to vector<2x128xf32>
    %224 = arith.maximumf %222, %223 : vector<2x128xf32>
    %225 = arith.truncf %224 : vector<2x128xf32> to vector<2x128xbf16>
    %c0_105 = arith.constant 0 : index
    %c0_106 = arith.constant 0 : index
    %226 = vector.load %arg10[%c0_105, %c0_106] : memref<2x128xbf16, #tpu.memory_space<vmem>>, vector<2x128xbf16>
    tpu.vector_store %arg10[%c0_105, %c0_106], %225 {strides = array<i32>} : memref<2x128xbf16, #tpu.memory_space<vmem>>, vector<2x128xbf16>,
    return
  }
  func.func @transform_0(%arg0: i32, %arg1: memref<16xi32, #tpu.memory_space<smem>>, %arg2: memref<16xi32, #tpu.memory_space<smem>>) -> (i32, i32) {
    %c0_i32 = arith.constant 0 : i32
    %c0_i32_0 = arith.constant 0 : i32
    %c0_i32_1 = arith.constant 0 : i32
    return %c0_i32, %c0_i32_0 : i32, i32
  }
  func.func @transform_1(%arg0: i32, %arg1: memref<16xi32, #tpu.memory_space<smem>>, %arg2: memref<16xi32, #tpu.memory_space<smem>>) -> (i32, i32) {
    %c0_i32 = arith.constant 0 : i32
    %c0_i32_0 = arith.constant 0 : i32
    %c0_i32_1 = arith.constant 0 : i32
    return %c0_i32, %c0_i32_0 : i32, i32
  }
  func.func @transform_2(%arg0: i32, %arg1: memref<16xi32, #tpu.memory_space<smem>>, %arg2: memref<16xi32, #tpu.memory_space<smem>>) -> (i32, i32) {
    %c0_i32 = arith.constant 0 : i32
    %c0_i32_0 = arith.constant 0 : i32
    %c0_i32_1 = arith.constant 0 : i32
    return %c0_i32, %c0_i32_0 : i32, i32
  }
  func.func @transform_3(%arg0: i32, %arg1: memref<16xi32, #tpu.memory_space<smem>>, %arg2: memref<16xi32, #tpu.memory_space<smem>>) -> (i32, i32) {
    %c0_i32 = arith.constant 0 : i32
    %c0_i32_0 = arith.constant 0 : i32
    %c0_i32_1 = arith.constant 0 : i32
    return %c0_i32, %c0_i32_0 : i32, i32
  }
  func.func @transform_4(%arg0: i32, %arg1: memref<16xi32, #tpu.memory_space<smem>>, %arg2: memref<16xi32, #tpu.memory_space<smem>>) -> (i32, i32) {
    %c0_i32 = arith.constant 0 : i32
    %c0_i32_0 = arith.constant 0 : i32
    %c0_i32_1 = arith.constant 0 : i32
    return %c0_i32, %c0_i32_0 : i32, i32
  }
  func.func @transform_5(%arg0: i32, %arg1: memref<16xi32, #tpu.memory_space<smem>>, %arg2: memref<16xi32, #tpu.memory_space<smem>>) -> (i32, i32) {
    %c0_i32 = arith.constant 0 : i32
    %c0_i32_0 = arith.constant 0 : i32
    %c0_i32_1 = arith.constant 0 : i32
    return %c0_i32, %c0_i32_0 : i32, i32
  }
  func.func @transform_6(%arg0: i32, %arg1: memref<16xi32, #tpu.memory_space<smem>>, %arg2: memref<16xi32, #tpu.memory_space<smem>>) -> (i32, i32) {
    %c0_i32 = arith.constant 0 : i32
    %c0_i32_0 = arith.constant 0 : i32
    %c0_i32_1 = arith.constant 0 : i32
    return %c0_i32, %c0_i32_0 : i32, i32
  }
  func.func @transform_7(%arg0: i32, %arg1: memref<16xi32, #tpu.memory_space<smem>>, %arg2: memref<16xi32, #tpu.memory_space<smem>>) -> (i32, i32) {
    %c0_i32 = arith.constant 0 : i32
    %c0_i32_0 = arith.constant 0 : i32
    %c0_i32_1 = arith.constant 0 : i32
    return %c0_i32, %c0_i32_0 : i32, i32
  }
}

</mosaic_0001>

<bundles_post_ra>
// kernel: tpu_custom_call.1
= control target key start
LH: loop header
LB: loop body
LE: loop exit
PB: predicated region body
PF: predicated region fallthrough
CT: control target
= control target key end

     0   :  { %s1464_s0 = inlined_call_operand.hbm [shape: s32[16], index: 0, kind: input, shape index: {}]   ;;  %s1465_s2 = inlined_call_operand.hbm [shape: f32[256,128], index: 2, kind: input, shape index: {}]   ;;  %s1466_s3 = inlined_call_operand.hbm [shape: bf16[128,128], index: 3, kind: input, shape index: {}]   ;;  %s1467_s4 = inlined_call_operand.vmem [shape: f32[1,128], index: 4, kind: input, shape index: {}]   ;;  %s1468_s5 = inlined_call_operand.hbm [shape: bf16[128,128], index: 5, kind: input, shape index: {}]   ;;  %s1469_s6 = inlined_call_operand.vmem [shape: f32[1,128], index: 6, kind: input, shape index: {}]   ;;  %s1470_s7 = inlined_call_operand.hbm [shape: bf16[128,128], index: 7, kind: input, shape index: {}]   ;;  %s1471_s8 = inlined_call_operand.vmem [shape: f32[1,128], index: 8, kind: input, shape index: {}]   ;;  %s1472_s9 = inlined_call_operand.hbm [shape: bf16[2,128], index: 9, kind: output, shape index: {}]   ;;  %s1473_s1 = inlined_call_operand.vmem [shape: s32[16], index: 1, kind: input, shape index: {}]  }
   0x1   :  { %s989_s11 = scalar_lea.hbm %s1464_s0, 16 }
   0x2   :  { %p990_p0 = scmp.ne.s32.totalorder %s1464_s0, %s989_s11  ;;  %p993_p1 = scmp.lt.u32.totalorder %s989_s11, %s1464_s0 }
   0x4   :  { %p995_p2 = pnand %p993_p1, %p990_p0 }
   0x6   :  { %998 = shalt.err (!%p995_p2)  }
   0x7   :  { %s1131_s16 = smov [#allocation4]   ;;  %s16_s21 = sshll.u32 %s1473_s1, 4  ;;  %s17_s21 = int_to_ptr.vmem [resolvable:$true] %s16_s21 }
   0x8   :  { %15 = dma.hbm_to_smem %s1464_s0, 16, %s1131_s16, [#allocation3] }
   0x9   :  { %s999_s22 = scalar_lea.vmem %s17_s21, 16  ;;  %p1004_p4 = scmp.lt.s32.totalorder %s17_s21, %s17_s21 }
   0xa   :  { %p1000_p3 = scmp.ne.s32.totalorder %s17_s21, %s999_s22  ;;  %p1005_p5 = scmp.lt.s32.totalorder %s999_s22, %s999_s22 }
   0xc   :  { %p1006_p6 = por %p1005_p5, %p1004_p4 }
   0xe   :  { %p1007_p7 = pnand %p1006_p6, %p1000_p3 }
  0x10   :  { %1010 = shalt.err (!%p1007_p7)  }
  0x11   :  { %s1132_s23 = smov [#allocation5]  }
  0x12   :  { %19 = dma.vmem_to_smem %s17_s21, 16, %s1132_s23, [#allocation3] }
  0x13   :  { %1121 = dma.done.wait [#allocation3], 32 }
  0x14   :  { %1122 = vsyncadd [#allocation3], 4294967264 }
  0x15   :  { %21 = sfence }
  0x16   :  { %22 = vsyncpa [#allocation7], 0 }
  0x17   :  { %23 = vsyncpa [#allocation10], 0 }
  0x18   :  { %24 = vsyncpa [#allocation13], 0 }
  0x19   :  { %25 = vsyncpa [#allocation8], 0  ;;  %s1133_s0 = smov [#allocation9]   ;;  %s1011_s26 = scalar_lea.hbm %s1466_s3, 1024 }
  0x1a   :  { %s43_s24 = sshll.u32 %s1133_s0, 4  ;;  %p1012_p8 = scmp.ne.s32.totalorder %s1466_s3, %s1011_s26  ;;  %s44_s24 = int_to_ptr.vmem [resolvable:$true] %s43_s24 }
  0x1b   :  { %p1015_p9 = scmp.lt.u32.totalorder %s1011_s26, %s1466_s3 }
  0x1d   :  { %p1017_p10 = pnand %p1015_p9, %p1012_p8 }
  0x1f   :  { %1020 = shalt.err (!%p1017_p10)
}
  0x20   :  { %s1021_s10 = scalar_lea.vmem %s44_s24, 1024  ;;  %p1026_p12 = scmp.lt.s32.totalorder %s44_s24, %s44_s24 }
  0x21   :  { %p1022_p11 = scmp.ne.s32.totalorder %s44_s24, %s1021_s10  ;;  %p1027_p13 = scmp.lt.s32.totalorder %s1021_s10, %s1021_s10 }
  0x23   :  { %p1028_p0 = por %p1027_p13, %p1026_p12 }
  0x25   :  { %p1029_p1 = pnand %p1028_p0, %p1022_p11 }
  0x27   :  { %1032 = shalt.err (!%p1029_p1)
}
  0x28   :  { %s1134_s11 = smov 64   ;;  %s1135_s12 = smov 4  }
  0x29   :  { %49 = dma.hbm_to_vmem [thread:$0]  %s1466_s3, 1024, %s44_s24, [#allocation10], %s1134_s11, %s1134_s11, %s1135_s12  }
  0x2a   :  { %s1136_s15 = smov [#allocation6]   ;;  %s1033_s19 = scalar_lea.hbm %s1465_s2, 4096 }
  0x2b   :  { %s31_s16 = sshll.u32 %s1136_s15, 4  ;;  %p1034_p2 = scmp.ne.s32.totalorder %s1465_s2, %s1033_s19  ;;  %s32_s16 = int_to_ptr.vmem [resolvable:$true] %s31_s16 }
  0x2c   :  { %p1037_p3 = scmp.lt.u32.totalorder %s1033_s19, %s1465_s2 }
  0x2e   :  { %p1039_p4 = pnand %p1037_p3, %p1034_p2 }
  0x30   :  { %1042 = shalt.err (!%p1039_p4)
}
  0x31   :  { %s1043_s0 = scalar_lea.vmem %s32_s16, 4096  ;;  %p1048_p6 = scmp.lt.s32.totalorder %s32_s16, %s32_s16 }
  0x32   :  { %p1044_p5 = scmp.ne.s32.totalorder %s32_s16, %s1043_s0  ;;  %p1049_p7 = scmp.lt.s32.totalorder %s1043_s0, %s1043_s0 }
  0x34   :  { %p1050_p8 = por %p1049_p7, %p1048_p6 }
  0x36   :  { %p1051_p9 = pnand %p1050_p8, %p1044_p5 }
  0x38   :  { %1054 = shalt.err (!%p1051_p9)
}
  0x39   :  { %s1137_s3 = smov 128   ;;  %s1138_s24 = smov 8  }
  0x3a   :  { %37 = dma.hbm_to_vmem [thread:$0]  %s1465_s2, 4096, %s32_s16, [#allocation7], %s1137_s3, %s1137_s3, %s1138_s24  }
  0x3b   :  { %s1139_s26 = smov [#allocation11]   ;;  %s1140_s28 = smov [#allocation12]  }
  0x3c   :  { %s57_s27 = sshll.u32 %s1139_s26, 4  ;;  %s71_s29 = sshll.u32 %s1140_s28, 4  ;;  %s58_s27 = int_to_ptr.vmem [resolvable:$true] %s57_s27  ;;  %s1236_s29 = int_to_ptr.vmem [resolvable:$true] %s71_s29 }
  0x3d   :  { %s1055_s13 = scalar_lea.hbm %s1468_s5, 1024 }
  0x3e   :  { %p1056_p10 = scmp.ne.s32.totalorder %s1468_s5, %s1055_s13  ;;  %p1059_p11 = scmp.lt.u32.totalorder %s1055_s13, %s1468_s5 }
  0x40   :  { %p1061_p12 = pnand %p1059_p11, %p1056_p10 }
  0x42   :  { %1064 = shalt.err (!%p1061_p12)
}
  0x43   :  { %s1065_s2 = scalar_lea.vmem %s58_s27, 1024  ;;  %p1070_p0 = scmp.lt.s32.totalorder %s58_s27, %s58_s27 }
  0x44   :  { %p1066_p13 = scmp.ne.s32.totalorder %s58_s27, %s1065_s2  ;;  %p1071_p1 = scmp.lt.s32.totalorder %s1065_s2, %s1065_s2 }
  0x46   :  { %p1072_p2 = por %p1071_p1, %p1070_p0 }
  0x48   :  { %p1073_p3 = pnand %p1072_p2, %p1066_p13 }
  0x4a   :  { %1076 = shalt.err (!%p1073_p3)
}
  0x4b   :  { %63 = dma.hbm_to_vmem [thread:$0]  %s1468_s5, 1024, %s58_s27, [#allocation10], %s1134_s11, %s1134_s11, %s1135_s12  }
  0x4c   :  { %s1077_s22 = scalar_lea.hbm %s1470_s7, 1024 }
  0x4d   :  { %p1078_p4 = scmp.ne.s32.totalorder %s1470_s7, %s1077_s22  ;;  %p1081_p5 = scmp.lt.u32.totalorder %s1077_s22, %s1470_s7 }
  0x4f   :  { %p1083_p6 = pnand %p1081_p5, %p1078_p4 }
  0x51   :  { %1086 = shalt.err (!%p1083_p6)
}
  0x52   :  { %s1087_s1 = scalar_lea.vmem %s1236_s29, 1024  ;;  %p1092_p8 = scmp.lt.s32.totalorder %s1236_s29, %s1236_s29 }
  0x53   :  { %p1088_p7 = scmp.ne.s32.totalorder %s1236_s29, %s1087_s1  ;;  %p1093_p9 = scmp.lt.s32.totalorder %s1087_s1, %s1087_s1 }
  0x55   :  { %p1094_p10 = por %p1093_p9, %p1092_p8 }
  0x57   :  { %p1095_p11 = pnand %p1094_p10, %p1088_p7 }
  0x59   :  { %1098 = shalt.err (!%p1095_p11)
}
  0x5a   :  { %77 = dma.hbm_to_vmem [thread:$0]  %s1470_s7, 1024, %s1236_s29, [#allocation13], %s1134_s11, %s1134_s11, %s1135_s12  }
  0x5b   :  { %1123 = dma.done.wait [#allocation7], 4096  }
  0x5c   :  { %1124 = vsyncadd [#allocation7], 4294963200 }
  0x5d   :  { %1125 = dma.done.wait [#allocation10], 2048  }
  0x5e   :  { %1126 = vsyncadd [#allocation10], 4294965248 }
  0x5f   :  { %1127 = dma.done.wait [#allocation13], 1024  }
  0x60   :  { %1128 = vsyncadd [#allocation13], 4294966272  ;;  %v1141_v0 = vmov 0.0   ;;  %vm1142_vm0 = vmmov 0   ;;  %s93_s26 = sld [smem:[#allocation4]]  ;;  %s1276_s28 = sld [smem:[#allocation4 + $0x1]] }
  0x61   :  { %892 = vmatprep.subr.bf16.mxu0 %v1141_v0  ;;  %908 = vmatprep.mubr.msk.bf16.mxu0 %vm1142_vm0, %v1141_v0  ;;  %s98_s27 = sld [smem:[#allocation5]]  ;;  %s1278_s30 = sld [smem:[#allocation5 + $0x1]]  ;;  %v965_v1 = vld [vmem:[#allocation9] sm:$0xff]   ;;  %v966_v2 = vld [vmem:[#allocation9 + $0x8] sm:$0xff]   ;;  %v967_v3 = vld [vmem:[#allocation9 + $0x10] sm:$0xff]  }
  0x62   :  { %912 = vmatprep.subr.bf16.mxu1 %v1141_v0  ;;  %928 = vmatprep.mubr.msk.bf16.mxu1 %vm1142_vm0, %v1141_v0  ;;  %s1283_s7 = sld [smem:[#allocation4 + $0x2]]  ;;  %s1287_s12 = sld [smem:[#allocation4 + $0x3]]  ;;  %v973_v4 = vld [vmem:[#allocation11] sm:$0xff]   ;;  %v968_v5 = vld [vmem:[#allocation9 + $0x18] sm:$0xff]   ;;  %v974_v6 = vld [vmem:[#allocation11 + $0x8] sm:$0xff]  }
  0x63   :  { %s1285_s11 = sld [smem:[#allocation5 + $0x2]]  ;;  %s1289_s29 = sld [smem:[#allocation5 + $0x3]]  ;;  %893 = vmatpush3.bf16.msra.mxu0 %v965_v1  ;;  %913 = vmatpush3.bf16.msra.mxu1 %v973_v4  ;;  %v969_v7 = vld [vmem:[#allocation9 + $0x20] sm:$0xff]   ;;  %v975_v8 = vld [vmem:[#allocation11 + $0x10] sm:$0xff]   ;;  %v970_v9 = vld [vmem:[#allocation9 + $0x28] sm:$0xff]  }
  0x64   :  { %s1291_s10 = sld [smem:[#allocation4 + $0x4]]  ;;  %s1295_s14 = sld [smem:[#allocation4 + $0x5]]  ;;  %894 = vmatprep.subr.bf16.mxu0 %v1141_v0  ;;  %914 = vmatprep.subr.bf16.mxu1 %v1141_v0  ;;  %v976_v10 = vld [vmem:[#allocation11 + $0x18] sm:$0xff]   ;;  %v971_v11 = vld [vmem:[#allocation9 + $0x30] sm:$0xff]   ;;  %v977_v12 = vld [vmem:[#allocation11 + $0x20] sm:$0xff]  }
  0x65   :  { %s1293_s13 = sld [smem:[#allocation5 + $0x4]]  ;;  %s1297_s15 = sld [smem:[#allocation5 + $0x5]]  ;;  %v972_v17 = vld [vmem:[#allocation9 + $0x38] sm:$0xff]   ;;  %v978_v18 = vld [vmem:[#allocation11 + $0x28] sm:$0xff]  }
  0x66   :  { %p94_p12 = scmp.gt.s32.totalorder %s93_s26, 0  ;;  %p696_p13 = scmp.lt.s32.totalorder %s93_s26, 255 }
  0x67   :  { %p99_p0 = scmp.eq.s32.totalorder %s98_s27, 0  ;;  %p108_p1 = scmp.gt.s32.totalorder %s1276_s28, 0  ;;  %895 = vmatpush3.bf16.msra.mxu0 %v966_v2  ;;  %915 = vmatpush3.bf16.msra.mxu1 %v974_v6 }
  0x68   :  { %s1475_s26 = smov (!%p94_p12, %s93_s26), 0  ;;  %896 = vmatprep.subr.bf16.mxu0 %v1141_v0  ;;  %p702_p2 = scmp.lt.s32.totalorder %s1276_s28, 255  ;;  %916 = vmatprep.subr.bf16.mxu1 %v1141_v0 }
  0x69   :  { %s1477_s26 = smov (!%p696_p13, %s1475_s26), 255  ;;  %p113_p3 = scmp.eq.s32.totalorder %s1278_s30, 0 }
  0x6a   :  { %s109_s17 = scalar_select %p108_p1, %s1276_s28, 0 }
  0x6b   :  { %s1305_s18 = scalar_select %p99_p0, 1, 0  ;;  %897 = vmatpush3.bf16.msra.mxu0 %v967_v3  ;;  %917 = vmatpush3.bf16.msra.mxu1 %v975_v8 }
  0x6c   :  { %p122_p4 = scmp.gt.s32.totalorder %s1283_s7, 0  ;;  %898 = vmatprep.subr.bf16.mxu0 %v1141_v0  ;;  %s1479_s17 = smov (!%p702_p2, %s109_s17), 255  ;;  %918 = vmatprep.subr.bf16.mxu1 %v1141_v0 }
  0x6d   :  { %s101_s2 = scvt.s32.f32 %s1305_s18  ;;  %p709_p5 = scmp.lt.s32.totalorder %s1283_s7, 255 }
  0x6e   :  { %s1314_s16 = scalar_select %p113_p3, 1, 0 }
  0x6f   :  { %899 = vmatpush3.bf16.msra.mxu0 %v968_v5  ;;  %p127_p6 = scmp.eq.s32.totalorder %s1285_s11, 0  ;;  %s1481_s7 = smov (!%p122_p4, %s1283_s7), 0  ;;  %919 = vmatpush3.bf16.msra.mxu1 %v976_v10  ;;  %v104_v14 = vstv %s101_s2 }
  0x70   :  { %s115_s19 = scvt.s32.f32 %s1314_s16  ;;  %900 = vmatprep.subr.bf16.mxu0 %v1141_v0  ;;  %s1483_s7 = smov (!%p709_p5, %s1481_s7), 255  ;;  %920 = vmatprep.subr.bf16.mxu1 %v1141_v0 }
  0x71   :  { %s1322_s20 = scalar_select %p127_p6, 1, 0 }
  0x72   :  { %p136_p7 = scmp.gt.s32.totalorder %s1287_s12, 0  ;;  %p716_p8 = scmp.lt.s32.totalorder %s1287_s12, 255  ;;  %v118_v16 = vstv %s115_s19 }
  0x73   :  { %901 = vmatpush3.bf16.msra.mxu0 %v969_v7  ;;  %s129_s21 = scvt.s32.f32 %s1322_s20  ;;  %p141_p9 = scmp.eq.s32.totalorder %s1289_s29, 0  ;;  %921 = vmatpush3.bf16.msra.mxu1 %v977_v12 }
  0x74   :  { %902 = vmatprep.subr.bf16.mxu0 %v1141_v0  ;;  %s1485_s12 = smov (!%p136_p7, %s1287_s12), 0  ;;  %p150_p10 = scmp.gt.s32.totalorder %s1291_s10, 0  ;;  %922 = vmatprep.subr.bf16.mxu1 %v1141_v0 }
  0x75   :  { %s1487_s12 = smov (!%p716_p8, %s1485_s12), 255  ;;  %s102_s22 = scalar_lea.vmem [#allocation6], %s1477_s26  ;;  %v132_v22 = vstv %s129_s21 }
  0x76   :  { %v103_v13 = vld [vmem:[%s102_s22] sm:$0x1]  ;;  %s1339_s23 = scalar_select %p141_p9, 1, 0 }
  0x77   :  { %903 = vmatpush3.bf16.msra.mxu0 %v970_v9  ;;  %p723_p11 = scmp.lt.s32.totalorder %s1291_s10, 255  ;;  %s116_s0 = scalar_lea.vmem [#allocation6], %s1479_s17  ;;  %v105_v19 = vmul.f32 %v104_v14, %v103_v13  ;;  %923 = vmatpush3.bf16.msra.mxu1 %v978_v18  ;;  %v979_v18 = vld [vmem:[#allocation11 + $0x30] sm:$0xff]  }
  0x78   :  { %904 = vmatprep.subr.bf16.mxu0 %v1141_v0  ;;  %v117_v15 = vld [vmem:[%s116_s0] sm:$0x1]  ;;  %s143_s3 = scvt.s32.f32 %s1339_s23  ;;  %p155_p12 = scmp.eq.s32.totalorder %s1293_s13, 0  ;;  %924 = vmatprep.subr.bf16.mxu1 %v1141_v0 }
  0x79   :  { %s151_s24 = scalar_select %p150_p10, %s1291_s10, 0  ;;  %v119_v20 = vmul.f32 %v118_v16, %v117_v15 }
  0x7a   :  { %s1354_s1 = scalar_select %p155_p12, 1, 0  ;;  %v146_v26 = vstv %s143_s3 }
  0x7b   :  { %905 = vmatpush3.bf16.msra.mxu0 %v971_v11  ;;  %s1489_s24 = smov (!%p723_p11, %s151_s24), 255  ;;  %s130_s5 = scalar_lea.vmem [#allocation6], %s1483_s7  ;;  %v120_v23 = vadd.f32 %v119_v20, %v105_v19  ;;  %925 = vmatpush3.bf16.msra.mxu1 %v979_v18  ;;  %v980_v19 = vld [vmem:[#allocation11 + $0x38] sm:$0xff]   ;;  %v981_v20 = vld [vmem:[#allocation12] sm:$0xff]  }
  0x7c   :  { %906 = vmatprep.subr.bf16.mxu0 %v1141_v0  ;;  %v131_v21 = vld [vmem:[%s130_s5] sm:$0x1]  ;;  %s157_s25 = scvt.s32.f32 %s1354_s1  ;;  %p164_p13 = scmp.gt.s32.totalorder %s1295_s14, 0  ;;  %926 = vmatprep.subr.bf16.mxu1 %v1141_v0 }
  0x7d   :  { %p730_p0 = scmp.lt.s32.totalorder %s1295_s14, 255  ;;  %v133_v24 = vmul.f32 %v132_v22, %v131_v21  ;;  %p169_p1 = scmp.eq.s32.totalorder %s1297_s15, 0  ;;  %v982_v21 = vld [vmem:[#allocation12 + $0x8] sm:$0xff]   ;;  %v983_v22 = vld [vmem:[#allocation12 + $0x10] sm:$0xff]  }
  0x7e   :  { %s1491_s14 = smov (!%p164_p13, %s1295_s14), 0  ;;  %s1368_s26 = sld [smem:[#allocation4 + $0x6]]  ;;  %v160_v30 = vstv %s157_s25 }
  0x7f   :  { %907 = vmatpush3.bf16.msra.mxu0 %v972_v17  ;;  %s144_s27 = scalar_lea.vmem [#allocation6], %s1487_s12  ;;  %s1493_s14 = smov (!%p730_p0, %s1491_s14), 255  ;;  %v134_v27 = vadd.f32 %v133_v24, %v120_v23  ;;  %927 = vmatpush3.bf16.msra.mxu1 %v980_v19  ;;  %v984_v23 = vld [vmem:[#allocation12 + $0x18] sm:$0xff]   ;;  %v985_v24 = vld [vmem:[#allocation12 + $0x20] sm:$0xff]  }
  0x80   :  { %932 = vmatprep.subr.bf16.mxu0 %v1141_v0  ;;  %v145_v25 = vld [vmem:[%s144_s27] sm:$0x1]  ;;  %s170_s28 = scalar_select %p169_p1, 1, 0 }
  0x81   :  { %s742_s30 = sld [smem:[#allocation5 + $0x6]]  ;;  %v147_v28 = vmul.f32 %v146_v26, %v145_v25  ;;  %s1374_s11 = sld [smem:[#allocation4 + $0x7]]  ;;  %v986_v25 = vld [vmem:[#allocation12 + $0x28] sm:$0xff]   ;;  %v806_v26 = vld [vmem:[%s1467_s4] ss:$0 sm:$0xff] }
  0x82   :  { %s171_s7 = scvt.s32.f32 %s170_s28  ;;  %s158_s29 = scalar_lea.vmem [#allocation6], %s1489_s24 }
  0x83   :  { %v159_v29 = vld [vmem:[%s158_s29] sm:$0x1]  ;;  %s1376_s10 = sld [smem:[#allocation5 + $0x7]]  ;;  %s1378_s13 = sld [smem:[#allocation4 + $0x8]]  ;;  %v148_v31 = vadd.f32 %v147_v28, %v134_v27 }
  0x84   :  { %p178_p2 = scmp.gt.s32.totalorder %s1368_s26, 0  ;;  %p737_p3 = scmp.lt.s32.totalorder %s1368_s26, 255  ;;  %v161_v32 = vmul.f32 %v160_v30, %v159_v29  ;;  %v174_v34 = vstv %s171_s7 }
  0x85   :  { %s1382_s12 = sld [smem:[#allocation5 + $0x8]]  ;;  %s1384_s15 = sld [smem:[#allocation4 + $0x9]] }
  0x86   :  { %s1495_s26 = smov (!%p178_p2, %s1368_s26), 0  ;;  %s172_s17 = scalar_lea.vmem [#allocation6], %s1493_s14  ;;  %v162_v35 = vadd.f32 %v161_v32, %v148_v31 }
  0x87   :  { %v173_v33 = vld [vmem:[%s172_s17] sm:$0x1]  ;;  %p183_p4 = scmp.eq.s32.totalorder %s742_s30, 0  ;;  %s1387_s18 = sld [smem:[#allocation5 + $0x9]] }
  0x88   :  { %s1497_s26 = smov (!%p737_p3, %s1495_s26), 255  ;;  %v175_v36 = vmul.f32 %v174_v34, %v173_v33  ;;  %p192_p5 = scmp.gt.s32.totalorder %s1374_s11, 0  ;;  %v987_v34 = vld [vmem:[#allocation12 + $0x30] sm:$0xff]  }
  0x89   :  { %s184_s2 = scalar_select %p183_p4, 1, 0 }
  0x8a   :  { %s186_s19 = scalar_lea.vmem [#allocation6], %s1497_s26  ;;  %p744_p6 = scmp.lt.s32.totalorder %s1374_s11, 255  ;;  %v176_v39 = vadd.f32 %v175_v36, %v162_v35  ;;  %v988_v35 = vld [vmem:[#allocation12 + $0x38] sm:$0xff]  }
  0x8b   :  { %s185_s16 = scvt.s32.f32 %s184_s2  ;;  %v187_v37 = vld [vmem:[%s186_s19] sm:$0x1]  ;;  %s1499_s11 = smov (!%p192_p5, %s1374_s11), 0 }
  0x8c   :  { %p197_p7 = scmp.eq.s32.totalorder %s1376_s10, 0  ;;  %p208_p8 = scmp.gt.s32.totalorder %s1378_s13, 0  ;;  %v815_v36 = vld [vmem:[%s1469_s6] ss:$0 sm:$0xff] }
  0x8d   :  { %v188_v38 = vstv %s185_s16  ;;  %s1501_s11 = smov (!%p744_p6, %s1499_s11), 255  ;;  %p751_p9 = scmp.lt.s32.totalorder %s1378_s13, 255 }
  0x8e   :  { %v189_v40 = vmul.f32 %v188_v38, %v187_v37  ;;  %s198_s14 = scalar_select %p197_p7, 1, 0 }
  0x8f   :  { %s200_s21 = scalar_lea.vmem [#allocation6], %s1501_s11  ;;  %p213_p10 = scmp.eq.s32.totalorder %s1382_s12, 0 }
  0x90   :  { %s199_s20 = scvt.s32.f32 %s198_s14  ;;  %v201_v41 = vld [vmem:[%s200_s21] sm:$0x1]  ;;  %v190_v42 = vadd.f32 %v189_v40, %v176_v39  ;;  %s1503_s13 = smov (!%p208_p8, %s1378_s13), 0 }
  0x91   :  { %s1397_s22 = scalar_select %p213_p10, 1, 0 }
  0x92   :  { %v202_v43 = vstv %s199_s20  ;;  %s1505_s13 = smov (!%p751_p9, %s1503_s13), 255  ;;  %p222_p11 = scmp.gt.s32.totalorder %s1384_s15, 0 }
  0x93   :  { %v203_v44 = vmul.f32 %v202_v43, %v201_v41  ;;  %s215_s23 = scvt.s32.f32 %s1397_s22  ;;  %p758_p12 = scmp.lt.s32.totalorder %s1384_s15, 255 }
  0x94   :  { %s1507_s15 = smov (!%p222_p11, %s1384_s15), 0  ;;  %p227_p13 = scmp.eq.s32.totalorder %s1387_s18, 0 }
  0x95   :  { %v204_v45 = vadd.f32 %v203_v44, %v190_v42  ;;  %s764_s0 = sld [smem:[#allocation4 + $0xa]]  ;;  %s1509_s15 = smov (!%p758_p12, %s1507_s15), 255  ;;  %v218_v48 = vstv %s215_s23  ;;  %v824_v44 = vld [vmem:[%s1471_s8] ss:$0 sm:$0xff] }
  0x96   :  { %s1408_s3 = scalar_select %p227_p13, 1, 0 }
  0x97   :  { %v205_v46 = vmul.f32 0.125, %v204_v45  ;;  %s770_s24 = sld [smem:[#allocation5 + $0xa]]  ;;  %s771_s5 = sld [smem:[#allocation4 + $0xb]] }
  0x98   :  { %s229_s1 = scvt.s32.f32 %s1408_s3  ;;  %s777_s25 = sld [smem:[#allocation5 + $0xb]] }
  0x99   :  { %206 = vst [vmem:[#allocation2] sm:$0x1] %v205_v46  ;;  %s1411_s26 = sld [smem:[#allocation4 + $0xc]]  ;;  %s1413_s28 = sld [smem:[#allocation4 + $0xd]] }
  0x9a   :  { %s784_s27 = sld [smem:[#allocation5 + $0xc]]  ;;  %s1415_s30 = sld [smem:[#allocation5 + $0xd]]  ;;  %v232_v50 = vstv %s229_s1 }
  0x9b   :  { %p236_p0 = scmp.gt.s32.totalorder %s764_s0, 0  ;;  %p765_p1 = scmp.lt.s32.totalorder %s764_s0, 255 }
  0x9c   :  { %s216_s10 = scalar_lea.vmem [#allocation6], %s1505_s13  ;;  %s230_s12 = scalar_lea.vmem [#allocation6], %s1509_s15 }
  0x9d   :  { %s1511_s0 = smov (!%p236_p0, %s764_s0), 0  ;;  %p241_p2 = scmp.eq.s32.totalorder %s770_s24, 0  ;;  %v217_v47 = vld [vmem:[%s216_s10] sm:$0x1] }
  0x9e   :  { %s1513_s0 = smov (!%p765_p1, %s1511_s0), 255  ;;  %p250_p3 = scmp.gt.s32.totalorder %s771_s5, 0  ;;  %v231_v49 = vld [vmem:[%s230_s12] sm:$0x1]  ;;  %v219_v51 = vmul.f32 %v218_v48, %v217_v47 }
  0x9f   :  { %s242_s7 = scalar_select %p241_p2, 1, 0  ;;  %v233_v52 = vmul.f32 %v232_v50, %v231_v49 }
  0xa0   :  { %p772_p4 = scmp.lt.s32.totalorder %s771_s5, 255  ;;  %s1515_s5 = smov (!%p250_p3, %s771_s5), 0 }
  0xa1   :  { %s243_s11 = scvt.s32.f32 %s242_s7  ;;  %p255_p5 = scmp.eq.s32.totalorder %s777_s25, 0  ;;  %v234_v55 = vadd.f32 %v233_v52, %v219_v51 }
  0xa2   :  { %p264_p6 = scmp.gt.s32.totalorder %s1411_s26, 0  ;;  %s1517_s5 = smov (!%p772_p4, %s1515_s5), 255 }
  0xa3   :  { %s256_s29 = scalar_select %p255_p5, 1, 0  ;;  %v246_v54 = vstv %s243_s11 }
  0xa4   :  { %p779_p7 = scmp.lt.s32.totalorder %s1411_s26, 255  ;;  %p269_p8 = scmp.eq.s32.totalorder %s784_s27, 0 }
  0xa5   :  { %s257_s17 = scvt.s32.f32 %s256_s29  ;;  %s1519_s26 = smov (!%p264_p6, %s1411_s26), 0 }
  0xa6   :  { %s270_s18 = scalar_select %p269_p8, 1, 0 }
  0xa7   :  { %s1521_s26 = smov (!%p779_p7, %s1519_s26), 255  ;;  %s244_s2 = scalar_lea.vmem [#allocation6], %s1513_s0  ;;  %v260_v58 = vstv %s257_s17 }
  0xa8   :  { %v245_v53 = vld [vmem:[%s244_s2] sm:$0x1]  ;;  %s271_s13 = scvt.s32.f32 %s270_s18  ;;  %p278_p9 = scmp.gt.s32.totalorder %s1413_s28, 0 }
  0xa9   :  { %p786_p10 = scmp.lt.s32.totalorder %s1413_s28, 255  ;;  %v247_v56 = vmul.f32 %v246_v54, %v245_v53  ;;  %p283_p11 = scmp.eq.s32.totalorder %s1415_s30, 0 }
  0xaa   :  { %s1523_s28 = smov (!%p278_p9, %s1413_s28), 0  ;;  %s792_s15 = sld [smem:[#allocation4 + $0xe]]  ;;  %v274_v62 = vstv %s271_s13 }
  0xab   :  { %s258_s16 = scalar_lea.vmem [#allocation6], %s1517_s5  ;;  %s1525_s28 = smov (!%p786_p10, %s1523_s28), 255  ;;  %v248_v59 = vadd.f32 %v247_v56, %v234_v55 }
  0xac   :  { %v259_v57 = vld [vmem:[%s258_s16] sm:$0x1]  ;;  %s284_s19 = scalar_select %p283_p11, 1, 0 }
  0xad   :  { %s798_s14 = sld [smem:[#allocation5 + $0xe]]  ;;  %v261_v60 = vmul.f32 %v260_v58, %v259_v57  ;;  %s1428_s20 = sld [smem:[#allocation4 + $0xf]] }
  0xae   :  { %s272_s21 = scalar_lea.vmem [#allocation6], %s1521_s26  ;;  %s285_s22 = scvt.s32.f32 %s284_s19 }
  0xaf   :  { %v273_v61 = vld [vmem:[%s272_s21] sm:$0x1]  ;;  %s805_s23 = sld [smem:[#allocation5 + $0xf]]  ;;  %v262_v63 = vadd.f32 %v261_v60, %v248_v59  ;;  %s286_s0 = scalar_lea.vmem [#allocation6], %s1525_s28 }
  0xb0   :  { %p292_p12 = scmp.gt.s32.totalorder %s792_s15, 0  ;;  %p793_p13 = scmp.lt.s32.totalorder %s792_s15, 255  ;;  %v275_v1 = vmul.f32 %v274_v62, %v273_v61  ;;  %v287_v2 = vld [vmem:[%s286_s0] sm:$0x1]  ;;  %v288_v3 = vstv %s285_s22 }
  0xb1   :  { %v289_v5 = vmul.f32 %v288_v3, %v287_v2  ;;  %s1143_s29 = smov [#allocation14]  }
  0xb2   :  { %s1527_s15 = smov (!%p292_p12, %s792_s15), 0  ;;  %v276_v4 = vadd.f32 %v275_v1, %v262_v63  ;;  %s669_s10 = sshll.u32 %s1143_s29, 4  ;;  %s670_s10 = int_to_ptr.vmem [resolvable:$true] %s669_s10 }
  0xb3   :  { %p297_p0 = scmp.eq.s32.totalorder %s798_s14, 0  ;;  %s1529_s15 = smov (!%p793_p13, %s1527_s15), 255 }
  0xb4   :  { %p306_p1 = scmp.gt.s32.totalorder %s1428_s20, 0  ;;  %s300_s1 = scalar_lea.vmem [#allocation6], %s1529_s15  ;;  %v290_v8 = vadd.f32 %v289_v5, %v276_v4 }
  0xb5   :  { %s298_s3 = scalar_select %p297_p0, 1, 0  ;;  %v301_v6 = vld [vmem:[%s300_s1] sm:$0x1] }
  0xb6   :  { %p800_p2 = scmp.lt.s32.totalorder %s1428_s20, 255  ;;  %s1531_s20 = smov (!%p306_p1, %s1428_s20), 0 }
  0xb7   :  { %s299_s24 = scvt.s32.f32 %s298_s3  ;;  %p311_p3 = scmp.eq.s32.totalorder %s805_s23, 0 }
  0xb8   :  { %s1533_s20 = smov (!%p800_p2, %s1531_s20), 255  ;;  %s1099_s6 = scalar_lea.vmem %s670_s10, 16 }
  0xb9   :  { %v302_v7 = vstv %s299_s24  ;;  %s312_s5 = scalar_select %p311_p3, 1, 0 }
  0xba   :  { %v303_v9 = vmul.f32 %v302_v7, %v301_v6  ;;  %s314_s26 = scalar_lea.vmem [#allocation6], %s1533_s20  ;;  %p1100_p4 = scmp.ne.s32.totalorder %s670_s10, %s1099_s6 }
  0xbb   :  { %s313_s25 = scvt.s32.f32 %s312_s5  ;;  %v315_v10 = vld [vmem:[%s314_s26] sm:$0x1]  ;;  %s1103_s12 = scalar_lea.vmem %s670_s10, 32 }
  0xbc   :  { %v304_v11 = vadd.f32 %v303_v9, %v290_v8  ;;  %p1104_p5 = scmp.lt.s32.totalorder %s670_s10, %s670_s10  ;;  %p1105_p6 = scmp.lt.s32.totalorder %s1103_s12, %s1099_s6 }
  0xbd   :  { %v316_v12 = vstv %s313_s25 }
  0xbe   :  { %v317_v13 = vmul.f32 %v316_v12, %v315_v10  ;;  %p1106_p7 = por %p1105_p6, %p1104_p5 }
  0xc0   :  { %v318_v14 = vadd.f32 %v317_v13, %v304_v11  ;;  %p1107_p8 = pnand %p1106_p7, %p1100_p4 }
  0xc2   :  { %v319_v15 = vmul.f32 0.125, %v318_v14 }
  0xc4   :  { %320 = vst [vmem:[#allocation2 + $0x1] sm:$0x1] %v319_v15 }
  0xcb   :  { %v321_v16 = vld [vmem:[#allocation2] sm:$0x3] }
  0xcc   :  { %v322_v17 = vpack.c.bf16 %v321_v16, %v321_v16 }
  0xce   :  { %909 = vmatmul.mubr.bf16.vlgmr.msra.gmra.mrb[0].mxu0 %v322_v17 }
  0xcf   :  { %948 = vmatprep.mubr.msk.bf16.mxu0 %vm1142_vm0, %v1141_v0  ;;  %933 = vmatpush3.bf16.msra.mxu0 %v981_v20 }
  0xd0   :  { %934 = vmatprep.subr.bf16.mxu0 %v1141_v0 }
  0xd3   :  { %935 = vmatpush3.bf16.msra.mxu0 %v982_v21 }
  0xd4   :  { %936 = vmatprep.subr.bf16.mxu0 %v1141_v0 }
  0xd7   :  { %937 = vmatpush3.bf16.msra.mxu0 %v983_v22 }
  0xd8   :  { %938 = vmatprep.subr.bf16.mxu0 %v1141_v0 }
  0xdb   :  { %939 = vmatpush3.bf16.msra.mxu0 %v984_v23 }
  0xdc   :  { %940 = vmatprep.subr.bf16.mxu0 %v1141_v0 }
  0xdf   :  { %941 = vmatpush3.bf16.msra.mxu0 %v985_v24 }
  0xe0   :  { %942 = vmatprep.subr.bf16.mxu0 %v1141_v0 }
  0xe3   :  { %943 = vmatpush3.bf16.msra.mxu0 %v986_v25 }
  0xe4   :  { %944 = vmatprep.subr.bf16.mxu0 %v1141_v0 }
  0xe7   :  { %945 = vmatpush3.bf16.msra.mxu0 %v987_v34 }
  0xe8   :  { %946 = vmatprep.subr.bf16.mxu0 %v1141_v0 }
  0xeb   :  { %947 = vmatpush3.bf16.msra.mxu0 %v988_v35 }
 0x1a1   :  { %v428_v27 = vpop.f32.mrb[0].mxu0 }
 0x1a2   :  { %v429_v28 = vadd.f32 %v806_v26, %v428_v27  ;;  %v910_v29 = vpop.f32.mrb[1].mxu0 }
 0x1a3   :  { %v431_v30 = vpop.f32.mrb[2].mxu0 }
 0x1a4   :  { %v434_v31 = vmax.f32 %v429_v28, 0.0  ;;  %v911_v32 = vpop.f32.mrb[3].mxu0 }
 0x1a6   :  { %v435_v33 = vpack.c.bf16 %v434_v31, %v434_v31 }
 0x1a8   :  { %929 = vmatmul.mubr.bf16.vlgmr.msra.gmra.mrb[0].mxu1 %v435_v33 }
 0x27b   :  { %v541_v37 = vpop.f32.mrb[0].mxu1 }
 0x27c   :  { %v542_v38 = vadd.f32 %v815_v36, %v541_v37  ;;  %v930_v39 = vpop.f32.mrb[1].mxu1 }
 0x27d   :  { %v544_v40 = vpop.f32.mrb[2].mxu1 }
 0x27e   :  { %v547_v41 = vmax.f32 %v542_v38, 0.0  ;;  %v931_v42 = vpop.f32.mrb[3].mxu1 }
 0x280   :  { %v548_v43 = vpack.c.bf16 %v547_v41, %v547_v41 }
 0x282   :  { %949 = vmatmul.mubr.bf16.vlgmr.msra.gmra.mrb[4].mxu0 %v548_v43 }
 0x355   :  { %v654_v45 = vpop.f32.mrb[4].mxu0 }
 0x356   :  { %v655_v0 = vadd.f32 %v824_v44, %v654_v45  ;;  %v950_v46 = vpop.f32.mrb[5].mxu0 }
 0x357   :  { %v657_v47 = vpop.f32.mrb[6].mxu0 }
 0x358   :  { %v660_v48 = vmax.f32 %v655_v0, 0.0  ;;  %v951_v49 = vpop.f32.mrb[7].mxu0 }
 0x35a   :  { %v661_v50 = vpack.c.bf16 %v660_v48, %v660_v48 }
 0x35c   :  { %662 = vst [vmem:[#allocation14] sm:$0x1] %v661_v50 }
 0x35d   :  { %1110 = shalt.err (!%p1107_p8)
}
 0x35e   :  { %s1111_s18 = scalar_lea.hbm %s1472_s9, 16 }
 0x35f   :  { %p1112_p9 = scmp.ne.s32.totalorder %s1472_s9, %s1111_s18  ;;  %p1115_p10 = scmp.lt.u32.totalorder %s1111_s18, %s1472_s9 }
 0x361   :  { %p1117_p11 = pnand %p1115_p10, %p1112_p9 }
 0x363   :  { %1120 = shalt.err (!%p1117_p11)
}
 0x364   :  { %672 = dma.vmem_to_hbm [thread:$0]  %s670_s10, 16, %s1472_s9, [#allocation8]  }
 0x365   :  { %1129 = dma.done.wait [#allocation8], 16  }
 0x366   :  { %1130 = vsyncadd [#allocation8], 4294967280 }
 0x367   :  { %676 = vsyncpa [#allocation7], 1 }
 0x368   :  { %677 = vsyncpa [#allocation10], 1 }
 0x369   :  { %678 = vsyncpa [#allocation13], 1 }
 0x36a   :  { %679 = vsyncpa [#allocation8], 1 }

</bundles_post_ra>
